<compile_context>
chip_gen: v7x
topology: tpu7x:2x2x1
jax: 0.10.0
libtpu: 0.0.40
codegen_flags: <defaults>
</compile_context>

<pallas_src>
import jax
import jax.numpy as jnp
from jax.experimental import pallas as pl
from jax.experimental.pallas import tpu as pltpu

_LANES = 128
_TARGET_BLOCK_BYTES = 8 * 1024 * 1024   # per-block byte budget (dtype-independent)
_MIN_SPLIT_BYTES = 4 * 1024 * 1024      # below this, one tile (no megacore split)
_VMEM_LIMIT_BYTES = 48 * 1024 * 1024    # 32 MiB of buffers + headroom; safe on v7x


def _exp_kernel(x_ref, o_ref):
    # Whole-tile elementwise exp (EUP transcendental; HBM DMA is the binding unit).
    o_ref[...] = jnp.exp(x_ref[...])


def _round_up(a: int, b: int) -> int:
    return -(-a // b) * b


def _choose_tile_rows(rows: int, itemsize: int) -> int:
    """Pick a tile row count from a byte budget, keeping the grid even when split."""
    sublane_mult = {4: 8, 2: 16, 1: 32}.get(itemsize, 8)
    row_bytes = _LANES * itemsize
    # Largest sublane-aligned tile within the per-block byte budget.
    budget_rows = max(sublane_mult,
                      (_TARGET_BLOCK_BYTES // row_bytes) // sublane_mult * sublane_mult)
    slab_bytes = rows * row_bytes
    if slab_bytes < _MIN_SPLIT_BYTES or rows <= sublane_mult:
        # Small slab: a single tile; splitting only adds per-step overhead.
        return min(budget_rows, _round_up(rows, sublane_mult))
    # Big slab: force an even number of near-equal tiles so the "parallel" grid
    # axis balances across both v7x TensorCores (no-op cost on v5e/v6e).
    n_pairs = -(-rows // (2 * budget_rows))
    n_tiles = 2 * n_pairs
    return min(budget_rows, _round_up(-(-rows // n_tiles), sublane_mult))


def expon(x: jax.Array, *, donate_input: bool = False) -> jax.Array:
    """Elementwise exp matching torch.exp semantics."""
    # torch.exp promotes integer/bool tensors to the default float dtype.
    if not jnp.issubdtype(x.dtype, jnp.floating):
        x = x.astype(jnp.float32)
    shape, dtype = x.shape, x.dtype
    n = x.size
    if n == 0:
        return jnp.exp(x)

    x_flat = x.reshape(-1)
    rows, rem = divmod(n, _LANES)
    if rows == 0:
        # Fewer than 128 elements: one vreg of work, not worth a pallas_call.
        return jnp.exp(x_flat).reshape(shape)

    bulk_n = rows * _LANES
    if rem == 0:
        bulk2d = x_flat.reshape(rows, _LANES)          # free reshape, no copy pass
    else:
        # Kernel handles the 128-aligned bulk only; the <128-element tail is
        # computed with plain jnp.exp below (no full-tensor pad/slice passes).
        bulk2d = x_flat[:bulk_n].reshape(rows, _LANES)

    itemsize = jnp.dtype(dtype).itemsize
    tile_rows = _choose_tile_rows(rows, itemsize)
    grid = (pl.cdiv(rows, tile_rows),)

    out2d = pl.pallas_call(
        _exp_kernel,
        out_shape=jax.ShapeDtypeStruct((rows, _LANES), dtype),
        grid_spec=pltpu.PrefetchScalarGridSpec(
            num_scalar_prefetch=0,
            grid=grid,
            in_specs=[pl.BlockSpec((tile_rows, _LANES), lambda i: (i, 0))],
            out_specs=pl.BlockSpec((tile_rows, _LANES), lambda i: (i, 0)),
        ),
        compiler_params=pltpu.CompilerParams(
            # Lets v7x shard the (balanced, even-length) grid across both TCs.
            dimension_semantics=("parallel",),
            vmem_limit_bytes=_VMEM_LIMIT_BYTES,
        ),
        cost_estimate=pl.CostEstimate(
            flops=0, transcendentals=bulk_n, bytes_accessed=2 * bulk_n * itemsize
        ),
        input_output_aliases=({0: 0} if donate_input else {}),
    )(bulk2d)

    if rem == 0:
        return out2d.reshape(shape)
    tail = jnp.exp(x_flat[bulk_n:])
    return jnp.concatenate([out2d.reshape(-1), tail]).reshape(shape)


if __name__ == "__main__":
    key = jax.random.PRNGKey(0)
    # Small NCHW-style input, consistent with a conv-net activation tensor.
    x = jax.random.normal(key, (2, 4, 16, 16), dtype=jnp.float32)

    y = jax.block_until_ready(expon(x))

    # Correctness check against the pure-JAX reference (== torch.exp semantics).
    ref = jnp.exp(x)
    assert y.shape == x.shape and y.dtype == x.dtype
    assert jnp.allclose(y, ref, rtol=1e-6, atol=1e-6)

    print("KERNEL_OK")
</pallas_src>

<mosaic_0001>
module attributes {stable_mosaic.version = 11 : i64} {
  func.func @_exp_kernel(%arg0: i32, %arg1: memref<16x128xf32, #tpu.memory_space<vmem>>, %arg2: memref<16x128xf32, #tpu.memory_space<vmem>>) attributes {dimension_semantics = [#tpu.dimension_semantics<parallel>], iteration_bounds = array<i64: 1>, scalar_prefetch = 0 : i64, scratch_operands = 0 : i64, tpu.core_type = #tpu.core_type<tc>, window_params = [{transform_indices = @transform_0, window_bounds = array<i64: 16, 128>}, {transform_indices = @transform_1, window_bounds = array<i64: 16, 128>}]} {
    %c0 = arith.constant 0 : index
    %c0_0 = arith.constant 0 : index
    %0 = vector.load %arg1[%c0, %c0_0] : memref<16x128xf32, #tpu.memory_space<vmem>>, vector<16x128xf32>
    %1 = math.exp %0 : vector<16x128xf32>
    %c0_1 = arith.constant 0 : index
    %c0_2 = arith.constant 0 : index
    %2 = vector.load %arg2[%c0_1, %c0_2] : memref<16x128xf32, #tpu.memory_space<vmem>>, vector<16x128xf32>
    tpu.vector_store %arg2[%c0_1, %c0_2], %1 {strides = array<i32>} : memref<16x128xf32, #tpu.memory_space<vmem>>, vector<16x128xf32>,
    return
  }
  func.func @transform_0(%arg0: i32) -> (i32, i32) {
    %c0_i32 = arith.constant 0 : i32
    %c0_i32_0 = arith.constant 0 : i32
    return %arg0, %c0_i32 : i32, i32
  }
  func.func @transform_1(%arg0: i32) -> (i32, i32) {
    %c0_i32 = arith.constant 0 : i32
    %c0_i32_0 = arith.constant 0 : i32
    return %arg0, %c0_i32 : i32, i32
  }
}

</mosaic_0001>

<bundles_post_ra>
// kernel: tpu_custom_call.1
= control target key start
LH: loop header
LB: loop body
LE: loop exit
PB: predicated region body
PF: predicated region fallthrough
CT: control target
= control target key end

     0   :  { %6 = vsyncpa [#allocation3], 0  ;;  %s148_s0 = inlined_call_operand.hbm [shape: f32[16,128], index: 0, kind: input, shape index: {}]   ;;  %s149_s1 = inlined_call_operand.hbm [shape: f32[16,128], index: 1, kind: output, shape index: {}]  }
   0x1   :  { %7 = vsyncpa [#allocation4], 0  ;;  %s104_s6 = smov [#allocation2]   ;;  %s56_s10 = scalar_lea.hbm %s148_s0, 256 }
   0x2   :  { %s13_s7 = sshll.u32 %s104_s6, 4  ;;  %p57_p0 = scmp.ne.s32.totalorder %s148_s0, %s56_s10  ;;  %s14_s7 = int_to_ptr.vmem [resolvable:$true] %s13_s7 }
   0x3   :  { %p60_p1 = scmp.lt.u32.totalorder %s56_s10, %s148_s0 }
   0x5   :  { %p62_p2 = pnand %p60_p1, %p57_p0 }
   0x7   :  { %65 = shalt.err (!%p62_p2)
}
   0x8   :  { %s66_s15 = scalar_lea.vmem %s14_s7, 256  ;;  %p71_p4 = scmp.lt.s32.totalorder %s14_s7, %s14_s7 }
   0x9   :  { %p67_p3 = scmp.ne.s32.totalorder %s14_s7, %s66_s15  ;;  %p72_p5 = scmp.lt.s32.totalorder %s66_s15, %s66_s15 }
   0xb   :  { %p73_p6 = por %p72_p5, %p71_p4 }
   0xd   :  { %p74_p7 = pnand %p73_p6, %p67_p3 }
   0xf   :  { %77 = shalt.err (!%p74_p7)
}
  0x10   :  { %s105_s16 = smov 128   ;;  %s106_s17 = smov 8  }
  0x11   :  { %19 = dma.hbm_to_vmem [thread:$0]  %s148_s0, 256, %s14_s7, [#allocation3], %s105_s16, %s105_s16, %s106_s17  }
  0x12   :  { %100 = dma.done.wait [#allocation3], 256  }
  0x13   :  { %101 = vsyncadd [#allocation3], 4294967040  ;;  %v23_v0 = vld [vmem:[#allocation2] sm:$0xff]  ;;  %v24_v1 = vld [vmem:[#allocation2 + $0x8] sm:$0xff]  ;;  %s107_s20 = smov [#allocation5]  }
  0x14   :  { %v25_v2 = vmul.f32 1.442695, %v23_v0  ;;  %v27_v3 = vmul.f32 1.442695, %v24_v1  ;;  %s36_s21 = sshll.u32 %s107_s20, 4  ;;  %s37_s21 = int_to_ptr.vmem [resolvable:$true] %s36_s21 }
  0x15   :  { %s78_s22 = scalar_lea.vmem %s37_s21, 256  ;;  %p83_p9 = scmp.lt.s32.totalorder %s37_s21, %s37_s21 }
  0x16   :  { %52 = vpow2.f32 %v25_v2  ;;  %p79_p8 = scmp.ne.s32.totalorder %s37_s21, %s78_s22  ;;  %p84_p10 = scmp.lt.s32.totalorder %s78_s22, %s78_s22 }
  0x17   :  { %54 = vpow2.f32 %v27_v3 }
  0x18   :  { %p85_p11 = por %p84_p10, %p83_p9 }
  0x1a   :  { %p86_p12 = pnand %p85_p11, %p79_p8 }
  0x20   :  { %v53_v4 = vpop.eup %52 }
  0x21   :  { %v55_v5 = vpop.eup %54  ;;  %29 = vst [vmem:[#allocation5] sm:$0xff] %v53_v4 }
  0x22   :  { %30 = vst [vmem:[#allocation5 + $0x8] sm:$0xff] %v55_v5 }
  0x23   :  { %89 = shalt.err (!%p86_p12)
}
  0x24   :  { %s90_s24 = scalar_lea.hbm %s149_s1, 256 }
  0x25   :  { %p91_p13 = scmp.ne.s32.totalorder %s149_s1, %s90_s24  ;;  %p94_p0 = scmp.lt.u32.totalorder %s90_s24, %s149_s1 }
  0x27   :  { %p96_p1 = pnand %p94_p0, %p91_p13 }
  0x29   :  { %99 = shalt.err (!%p96_p1)
}
  0x2a   :  { %42 = dma.vmem_to_hbm [thread:$0]  %s37_s21, 256, %s149_s1, [#allocation4], %s105_s16, %s105_s16, %s106_s17  }
  0x2b   :  { %102 = dma.done.wait [#allocation4], 256  }
  0x2c   :  { %103 = vsyncadd [#allocation4], 4294967040 }
  0x2d   :  { %46 = vsyncpa [#allocation3], 1 }
  0x2e   :  { %47 = vsyncpa [#allocation4], 1 }

</bundles_post_ra>
